<compile_context>
chip_gen: v6e
topology: v6e:2x2x1
jax: 0.10.0
libtpu: 0.0.40
codegen_flags: <defaults>
</compile_context>

<pallas_src>
import numpy as np
import jax
import jax.numpy as jnp
from jax import lax
from jax.experimental import pallas as pl
from jax.experimental.pallas import tpu as pltpu

EMBED = 32     # config.EMBED
VOCAB = 4096   # `discrete` ctor arg of MixedEmbedding (embedding table rows)


def make_mixed_embedding_kernel(R, C, D, E):
    """One grid step processes all R = B*N rows of one MixedEmbedding call."""
    CE = C * E

    def kernel(disc_smem, cont_ref, scat_ref, cbias_ref, table_hbm, out_ref,
               gather_buf, dma_sem):
        # ---- 1) Start the discrete gather: one small row DMA per (row, attr)
        #         from the HBM-resident table into VMEM scratch (d-major rows,
        #         so every later read is a static full-lane slice).
        def issue(r, carry):
            for d in range(D):                                   # D is 2-3: static
                idx = disc_smem[r * D + d]                       # i32 scalar (SMEM)
                pltpu.make_async_copy(
                    table_hbm.at[pl.ds(idx, 1), :],              # (1, E) HBM row
                    gather_buf.at[pl.ds(d * R + r, 1), :],       # (1, E) VMEM row
                    dma_sem,
                ).start()
            return carry

        lax.fori_loop(0, R, issue, None)

        # ---- 2) Continuous attrs: all C Linear(1, E) layers fused into ONE
        #         MXU matmul against the block-scatter matrix
        #         scat[c, c*E+e] = w_c[e]  =>  (cont @ scat)[r, c*E+e] = x[r,c]*w_c[e]
        #         This overlaps with the gather DMAs still in flight.
        cont_emb = jnp.dot(cont_ref[...], scat_ref[...],
                           preferred_element_type=jnp.float32) + cbias_ref[...]

        # ---- 3) One aggregate wait: the R*D row copies signal dma_sem with a
        #         total of D*R*E*4 bytes, exactly gather_buf's size, so a single
        #         wait sized to the whole scratch covers all of them.
        pltpu.make_async_copy(table_hbm.at[pl.ds(0, D * R), :], gather_buf,
                              dma_sem).wait()

        # ---- 4) Assemble the full (R, (C+D)*E) slab and store it ONCE
        #         (lane-dense; only the final partial 128-lane tile is masked).
        disc_parts = [gather_buf[pl.ds(d * R, R), :] for d in range(D)]   # (R, E) each
        out_ref[...] = jnp.concatenate([cont_emb] + disc_parts, axis=-1)

    return kernel


def prepare_continuous_params(cw, cb):
    """Fuse the C Linear(1, E) layers into one matmul operand (hoisted out of
    the per-step hot path; depends only on the weights)."""
    C, E = cw.shape
    scat = (jnp.eye(C, dtype=jnp.float32)[:, :, None]
            * cw[None, :, :].astype(jnp.float32)).reshape(C, C * E)
    cbias = cb.reshape(1, C * E).astype(jnp.float32)
    return scat, cbias


def mixed_embedding_forward(cont, disc, scat, cbias, table):
    """
    cont : (B, N, C) f32   - x['Continuous']
    disc : (B, N, D) int   - x['Discrete']
    scat : (C, C*E) f32    - fused Linear(1, E) weights (block-scatter matrix)
    cbias: (1, C*E) f32    - fused Linear(1, E) biases
    table: (V, E)   f32    - nn.Embedding(V, E) weight
    returns (B, N, C + D, E) f32
    """
    B, N, C = cont.shape
    D = disc.shape[-1]
    V, E = table.shape
    A = C + D
    R = B * N
    CE = C * E

    cont2 = cont.reshape(R, C).astype(jnp.float32)
    # PyTorch's Embedding would raise on an out-of-range index; clamp so the
    # data-dependent DMA can never read outside the table.
    disc_flat = jnp.clip(disc.reshape(R * D), 0, V - 1).astype(jnp.int32)

    kernel = make_mixed_embedding_kernel(R, C, D, E)
    out_flat = pl.pallas_call(
        kernel,
        out_shape=jax.ShapeDtypeStruct((R, A * E), jnp.float32),
        grid_spec=pltpu.PrefetchScalarGridSpec(
            num_scalar_prefetch=1,                 # disc_flat -> SMEM
            grid=(1,),                             # whole batch in one step
            in_specs=[
                pl.BlockSpec((R, C), lambda i, idx: (0, 0)),      # continuous obs
                pl.BlockSpec((C, CE), lambda i, idx: (0, 0)),     # fused scatter weights
                pl.BlockSpec((1, CE), lambda i, idx: (0, 0)),     # fused biases
                pl.BlockSpec(memory_space=pl.ANY),                # table stays in HBM
            ],
            out_specs=pl.BlockSpec((R, A * E), lambda i, idx: (0, 0)),
            scratch_shapes=[
                pltpu.VMEM((D * R, E), jnp.float32),              # gathered rows
                pltpu.SemaphoreType.DMA(()),                      # one DMA semaphore
            ],
        ),
        compiler_params=pltpu.CompilerParams(
            dimension_semantics=("arbitrary",)),
    )(disc_flat, cont2, scat, cbias, table)

    return out_flat.reshape(B, N, A, E)


def mixed_embedding_reference(cont, disc, cw, cb, table):
    """Plain-JAX mirror of MixedEmbedding.forward."""
    cont_emb = cont[..., None] * cw + cb          # (B, N, C, E)
    disc_emb = table[disc]                        # (B, N, D, E)
    return jnp.concatenate([cont_emb, disc_emb], axis=-2)


if __name__ == "__main__":
    key = jax.random.PRNGKey(0)

    B = 2
    # (C continuous attrs, D discrete attrs, N entities) -- Tile/Entity-like sizes.
    configs = {"Tile": (4, 2, 16), "Entity": (24, 3, 8)}

    fwd = jax.jit(mixed_embedding_forward)

    ok = True
    for i, (name, (C, D, N)) in enumerate(configs.items()):
        k = jax.random.split(jax.random.fold_in(key, i), 5)
        cont = jax.random.normal(k[0], (B, N, C), jnp.float32)
        disc = jax.random.randint(k[1], (B, N, D), 0, VOCAB, jnp.int32)
        cw = 0.1 * jax.random.normal(k[2], (C, EMBED), jnp.float32)
        cb = 0.1 * jax.random.normal(k[3], (C, EMBED), jnp.float32)
        table = 0.1 * jax.random.normal(k[4], (VOCAB, EMBED), jnp.float32)

        scat, cbias = prepare_continuous_params(cw, cb)   # hoisted weight prep
        out = fwd(cont, disc, scat, cbias, table)
        out = jax.block_until_ready(out)
        ref = mixed_embedding_reference(cont, disc, cw, cb, table)

        if out.shape != (B, N, C + D, EMBED):
            ok = False
        if not np.allclose(np.asarray(out), np.asarray(ref), rtol=2e-2, atol=2e-2):
            ok = False

    print("KERNEL_OK" if ok else "KERNEL_MISMATCH")
</pallas_src>

<mosaic_0001>
module attributes {stable_mosaic.version = 11 : i64} {
  func.func @kernel(%arg0: i32, %arg1: memref<64xi32, #tpu.memory_space<smem>>, %arg2: memref<32x4xf32, #tpu.memory_space<vmem>>, %arg3: memref<4x128xf32, #tpu.memory_space<vmem>>, %arg4: memref<1x128xf32, #tpu.memory_space<vmem>>, %arg5: memref<4096x32xf32, #tpu.memory_space<any>>, %arg6: memref<32x192xf32, #tpu.memory_space<vmem>>, %arg7: memref<64x32xf32, #tpu.memory_space<vmem>>, %arg8: memref<!tpu.dma_semaphore, #tpu.memory_space<semaphore_mem>>) attributes {dimension_semantics = [#tpu.dimension_semantics<arbitrary>], iteration_bounds = array<i64: 1>, scalar_prefetch = 1 : i64, scratch_operands = 2 : i64, tpu.core_type = #tpu.core_type<tc>, window_params = [{pipeline_mode = #tpu.pipeline_mode<synchronous>, transform_indices = @transform_0, window_bounds = array<i64: 32, 4>}, {pipeline_mode = #tpu.pipeline_mode<synchronous>, transform_indices = @transform_1, window_bounds = array<i64: 4, 128>}, {pipeline_mode = #tpu.pipeline_mode<synchronous>, transform_indices = @transform_2, window_bounds = array<i64: 1, 128>}, {}, {pipeline_mode = #tpu.pipeline_mode<synchronous>, transform_indices = @transform_4, window_bounds = array<i64: 32, 192>}]} {
    %c0_i32 = arith.constant 0 : i32
    %c32_i32 = arith.constant 32 : i32
    %0 = arith.addi %c0_i32, %c32_i32 : i32
    %c1_i32 = arith.constant 1 : i32
    scf.for %arg9 = %c0_i32 to %0 step %c1_i32  : i32 {
      %c2_i32 = arith.constant 2 : i32
      %12 = arith.muli %arg9, %c2_i32 : i32
      %c0_i32_13 = arith.constant 0 : i32
      %13 = arith.addi %12, %c0_i32_13 : i32
      %14 = arith.index_cast %13 : i32 to index
      %15 = memref.load %arg1[%14] : memref<64xi32, #tpu.memory_space<smem>>
      %c0_i32_14 = arith.constant 0 : i32
      %16 = arith.addi %c0_i32_14, %arg9 : i32
      %c0_i32_15 = arith.constant 0 : i32
      %17 = tpu.memref_slice %arg5[%15, %c0_i32_15] : memref<4096x32xf32, #tpu.memory_space<any>> -> memref<1x32xf32, #tpu.memory_space<any>>
      %c0_i32_16 = arith.constant 0 : i32
      %18 = tpu.memref_slice %arg7[%16, %c0_i32_16] : memref<64x32xf32, #tpu.memory_space<vmem>> -> memref<1x32xf32, #tpu.memory_space<vmem>>
      tpu.enqueue_dma source(%17 : memref<1x32xf32, #tpu.memory_space<any>>) target(%18 : memref<1x32xf32, #tpu.memory_space<vmem>>) target_semaphore(%arg8 : memref<!tpu.dma_semaphore, #tpu.memory_space<semaphore_mem>>)
      %c2_i32_17 = arith.constant 2 : i32
      %19 = arith.muli %arg9, %c2_i32_17 : i32
      %c1_i32_18 = arith.constant 1 : i32
      %20 = arith.addi %19, %c1_i32_18 : i32
      %21 = arith.index_cast %20 : i32 to index
      %22 = memref.load %arg1[%21] : memref<64xi32, #tpu.memory_space<smem>>
      %c32_i32_19 = arith.constant 32 : i32
      %23 = arith.addi %c32_i32_19, %arg9 : i32
      %c0_i32_20 = arith.constant 0 : i32
      %24 = tpu.memref_slice %arg5[%22, %c0_i32_20] : memref<4096x32xf32, #tpu.memory_space<any>> -> memref<1x32xf32, #tpu.memory_space<any>>
      %c0_i32_21 = arith.constant 0 : i32
      %25 = tpu.memref_slice %arg7[%23, %c0_i32_21] : memref<64x32xf32, #tpu.memory_space<vmem>> -> memref<1x32xf32, #tpu.memory_space<vmem>>
      tpu.enqueue_dma source(%24 : memref<1x32xf32, #tpu.memory_space<any>>) target(%25 : memref<1x32xf32, #tpu.memory_space<vmem>>) target_semaphore(%arg8 : memref<!tpu.dma_semaphore, #tpu.memory_space<semaphore_mem>>)
    }
    %c32_i32_0 = arith.constant 32 : i32
    %c0 = arith.constant 0 : index
    %c0_1 = arith.constant 0 : index
    %1 = vector.load %arg2[%c0, %c0_1] : memref<32x4xf32, #tpu.memory_space<vmem>>, vector<32x4xf32>
    %c0_2 = arith.constant 0 : index
    %c0_3 = arith.constant 0 : index
    %2 = vector.load %arg3[%c0_2, %c0_3] : memref<4x128xf32, #tpu.memory_space<vmem>>, vector<4x128xf32>
    %cst = arith.constant dense<0.000000e+00> : vector<32x128xf32>
    %3 = tpu.matmul %1, %2, %cst {dimension_numbers = #tpu.dot_dimension_numbers<[1], [0], [0], [1], [0, 0, 1, 1], [], []>} : vector<32x4xf32>, vector<4x128xf32>, vector<32x128xf32> -> vector<32x128xf32>
    %c0_4 = arith.constant 0 : index
    %c0_5 = arith.constant 0 : index
    %4 = vector.load %arg4[%c0_4, %c0_5] : memref<1x128xf32, #tpu.memory_space<vmem>>, vector<1x128xf32>
    %5 = vector.broadcast %4 : vector<1x128xf32> to vector<32x128xf32>
    %6 = arith.addf %3, %5 : vector<32x128xf32>
    %c0_i32_6 = arith.constant 0 : i32
    %c0_i32_7 = arith.constant 0 : i32
    %7 = tpu.memref_slice %arg5[%c0_i32_6, %c0_i32_7] : memref<4096x32xf32, #tpu.memory_space<any>> -> memref<64x32xf32, #tpu.memory_space<any>>
    tpu.wait_dma2 semaphore(%arg8 : memref<!tpu.dma_semaphore, #tpu.memory_space<semaphore_mem>>) src(%7 : memref<64x32xf32, #tpu.memory_space<any>>) dst(%arg7 : memref<64x32xf32, #tpu.memory_space<vmem>>)
    %c0_8 = arith.constant 0 : index
    %c0_9 = arith.constant 0 : index
    %8 = vector.load %arg7[%c0_8, %c0_9] : memref<64x32xf32, #tpu.memory_space<vmem>>, vector<32x32xf32>
    %c32 = arith.constant 32 : index
    %c0_10 = arith.constant 0 : index
    %9 = vector.load %arg7[%c32, %c0_10] : memref<64x32xf32, #tpu.memory_space<vmem>>, vector<32x32xf32>
    %10 = tpu.concatenate %6, %8, %9 in 1 : vector<32x128xf32>, vector<32x32xf32>, vector<32x32xf32> -> vector<32x192xf32>
    %c0_11 = arith.constant 0 : index
    %c0_12 = arith.constant 0 : index
    %11 = vector.load %arg6[%c0_11, %c0_12] : memref<32x192xf32, #tpu.memory_space<vmem>>, vector<32x192xf32>
    tpu.vector_store %arg6[%c0_11, %c0_12], %10 {strides = array<i32>} : memref<32x192xf32, #tpu.memory_space<vmem>>, vector<32x192xf32>,
    return
  }
  func.func @transform_0(%arg0: i32, %arg1: memref<64xi32, #tpu.memory_space<smem>>) -> (i32, i32) {
    %c0_i32 = arith.constant 0 : i32
    %c0_i32_0 = arith.constant 0 : i32
    %c0_i32_1 = arith.constant 0 : i32
    return %c0_i32, %c0_i32_0 : i32, i32
  }
  func.func @transform_1(%arg0: i32, %arg1: memref<64xi32, #tpu.memory_space<smem>>) -> (i32, i32) {
    %c0_i32 = arith.constant 0 : i32
    %c0_i32_0 = arith.constant 0 : i32
    %c0_i32_1 = arith.constant 0 : i32
    return %c0_i32, %c0_i32_0 : i32, i32
  }
  func.func @transform_2(%arg0: i32, %arg1: memref<64xi32, #tpu.memory_space<smem>>) -> (i32, i32) {
    %c0_i32 = arith.constant 0 : i32
    %c0_i32_0 = arith.constant 0 : i32
    %c0_i32_1 = arith.constant 0 : i32
    return %c0_i32, %c0_i32_0 : i32, i32
  }
  func.func @transform_4(%arg0: i32, %arg1: memref<64xi32, #tpu.memory_space<smem>>) -> (i32, i32) {
    %c0_i32 = arith.constant 0 : i32
    %c0_i32_0 = arith.constant 0 : i32
    %c0_i32_1 = arith.constant 0 : i32
    return %c0_i32, %c0_i32_0 : i32, i32
  }
}

</mosaic_0001>

<bundles_post_ra>
// kernel: mixed_embedding_forward.1
= control target key start
LH: loop header
LB: loop body
LE: loop exit
PB: predicated region body
PF: predicated region fallthrough
CT: control target
= control target key end

     0   :  { %s467_s0 = inlined_call_operand.vmem [shape: s32[64], index: 0, kind: input, shape index: {}]   ;;  %s468_s1 = inlined_call_operand.vmem [shape: f32[32,4], index: 1, kind: input, shape index: {}]   ;;  %s469_s2 = inlined_call_operand.vmem [shape: f32[4,128], index: 2, kind: input, shape index: {}]   ;;  %s470_s3 = inlined_call_operand.vmem [shape: f32[1,128], index: 3, kind: input, shape index: {}]   ;;  %s471_s4 = inlined_call_operand.vmem [shape: f32[4096,32], index: 4, kind: input, shape index: {}]   ;;  %s472_s5 = inlined_call_operand.vmem [shape: f32[32,192], index: 5, kind: output, shape index: {}]  }
   0x1   :  { %s10_s20 = sshll.u32 %s467_s0, 4  ;;  %s11_s20 = int_to_ptr.vmem [resolvable:$true] %s10_s20 }
   0x2   :  { %s360_s21 = scalar_lea.vmem %s11_s20, 16  ;;  %p365_p1 = scmp.lt.s32.totalorder %s11_s20, %s11_s20 }
   0x3   :  { %p361_p0 = scmp.ne.s32.totalorder %s11_s20, %s360_s21  ;;  %p366_p2 = scmp.lt.s32.totalorder %s360_s21, %s360_s21 }
   0x5   :  { %p367_p3 = por %p366_p2, %p365_p1 }
   0x7   :  { %p368_p4 = pnand %p367_p3, %p361_p0 }
   0x9   :  { %371 = shalt.err (!%p368_p4)  }
   0xa   :  { %s384_s22 = smov [#allocation5]  }
   0xb   :  { %13 = dma.vmem_to_smem %s11_s20, 16, %s384_s22, [#allocation4] }
   0xc   :  { %376 = dma.done.wait [#allocation4], 16 }
   0xd   :  { %377 = vsyncadd [#allocation4], 4294967280 }
   0xe   :  { %15 = sfence }
   0xf   :  { %s380_s23 = smov 0  }
  0x10 LB: > { %s325_s24 = sshll.u32 %s382_s23, 1  ;;  %s31_s28 = scalar_lea.vmem [#allocation2], %s382_s23  ;;  %s382_s23 = sphi %s380_s23, %s27_s23  }
  0x11   : > { %s29_s25 = sld [smem:[#allocation5 + %s325_s24]] }
  0x17   : > { %s30_s27 = scalar_lea.vmem %s471_s4, %s29_s25 }
  0x18   : > { %v50_v0 = vld [vmem:[%s30_s27] sm:$0x1] }
  0x19   : > { %51 = vst [vmem:[%s31_s28] sm:$0x1] %v50_v0 }
  0x1a   : > { %77 = vsyncadd [#allocation3], 16  ;;  %s78_s29 = sadd.s32 1, %s325_s24 }
  0x1b   : > { %s79_s30 = sld [smem:[#allocation5 + %s78_s29]] }
  0x21   : > { %s81_s8 = scalar_lea.vmem %s471_s4, %s79_s30 }
  0x22   : > { %v101_v1 = vld [vmem:[%s81_s8] sm:$0x1] }
  0x23   : > { %327 = vst [vmem:[%s31_s28 + $0x20] sm:$0x1] %v101_v1 }
  0x24   : > { %128 = vsyncadd [#allocation3], 16  ;;  %s27_s23 = sadd.s32 1, %s382_s23  }
  0x25   : > { %p24_p5 = scmp.ge.s32.totalorder %s27_s23, 32  }
  0x26   :  { %v133_v2 = vld [vmem:[%s469_s2] sm:$0xf] (%p24_p5)  ;;  %vm154_vm0 = vcmask (%p24_p5), 1043456   ;;  %vm141_vm1 = vcmask (%p24_p5), 31744   ;;  %v131_v4 = vld [vmem:[%s468_s1 + $0x10] sm:$0xff] (%p24_p5)  ;;  %v130_v5 = vld [vmem:[%s468_s1 + $0x8] sm:$0xff] (%p24_p5) }
  0x27   :  { %26 = sbr.rel (!%p24_p5) target bundleno = 16 (0x10), region = 123  ;;  %v129_v3 = vld [vmem:[%s468_s1] sm:$0xff] (%p24_p5)  ;;  %340 = vmatprep.subr.msk.mxu0 (%p24_p5), %vm154_vm0, %v133_v2  ;;  %348 = vmatprep.subr.msk.mxu1 (%p24_p5), %vm154_vm0, %v133_v2  ;;  %v132_v6 = vld [vmem:[%s468_s1 + $0x18] sm:$0xff] (%p24_p5) }
  0x28   :  { %341 = vmatpush3.msk.msra.mxu0 (%p24_p5), %vm154_vm0, %v133_v2  ;;  %349 = vmatpush3.msk.msra.mxu1 (%p24_p5), %vm154_vm0, %v133_v2  ;;  %v328_v7 = vld [vmem:[%s470_s3] ss:$0 sm:$0xff] (%p24_p5) }
  0x29   :  { %342 = vmatprep.mubr.msk.f32.mxu0 (%p24_p5), %vm141_vm1, %v129_v3  ;;  %345 = vmatprep.mubr.msk.f32.mxu1 (%p24_p5), %vm141_vm1, %v131_v4 }
  0x2a   :  { %343 = vmatmul.mubr.msk.f32.vlgmr.msra.gmra.mxu0 (%p24_p5), %vm141_vm1, %v130_v5  ;;  %346 = vmatmul.mubr.msk.f32.vlgmr.msra.gmra.mxu1 (%p24_p5), %vm141_vm1, %v132_v6 }
  0xea   :  { %v344_v8 = vpop.f32.mrf.mxu0  ;;  %v347_v9 = vpop.f32.mrf.mxu1 }
  0xeb   :  { %v230_v10 = vadd.f32 %v344_v8, %v328_v7  ;;  %v240_v11 = vadd.f32 %v347_v9, %v328_v7 }
  0xec   :  { %v224_v12 = vpop.f32.mrf.mxu0  ;;  %v234_v13 = vpop.f32.mrf.mxu1 }
  0xed   :  { %v225_v14 = vadd.f32 %v328_v7, %v224_v12  ;;  %v235_v15 = vadd.f32 %v328_v7, %v234_v13 }
  0xee   :  { %378 = dma.done.wait [#allocation3], 1024 }
  0xef   :  { %379 = vsyncadd [#allocation3], 4294966272  ;;  %275 = vst [vmem:[%s472_s5] sm:$0xff] %v225_v14  ;;  %v252_v16 = vld [vmem:[#allocation2 + $0x30] sm:$0xff]  ;;  %v250_v17 = vld [vmem:[#allocation2 + $0x20] sm:$0xff]  ;;  %s385_s25 = smov 32   ;;  %vm270_vm2 = vcmask 261120  }
  0xf0   :  { %278 = vst [vmem:[%s472_s5 + $0x10] sm:$0xff] %v230_v10  ;;  %280 = vst [vmem:[%s472_s5 + $0x20] sm:$0xff] %v235_v15  ;;  %262 = vrot.lane.b32.xlu1 %v252_v16, %s385_s25  ;;  %258 = vrot.lane.b32.xlu0 %v250_v17, %s385_s25  ;;  %v253_v18 = vld [vmem:[#allocation2 + $0x38] sm:$0xff]  ;;  %v251_v19 = vld [vmem:[#allocation2 + $0x28] sm:$0xff]  ;;  %vm276_vm3 = vcmask 523264  }
  0xf1   :  { %282 = vst [vmem:[%s472_s5 + $0x30] sm:$0xff] %v240_v11  ;;  %v248_v20 = vld [vmem:[#allocation2 + $0x10] sm:$0xff]  ;;  %v246_v21 = vld [vmem:[#allocation2] sm:$0xff]  ;;  %v249_v26 = vld [vmem:[#allocation2 + $0x18] sm:$0xff] }
  0xf2   :  { %v247_v27 = vld [vmem:[#allocation2 + $0x8] sm:$0xff] }
  0xf4   :  { %264 = vrot.lane.b32.xlu1 %v253_v18, %s385_s25  ;;  %260 = vrot.lane.b32.xlu0 %v251_v19, %s385_s25 }
 0x162   :  { %v263_v22 = vpop.permute.xlu1 %262  ;;  %v259_v23 = vpop.permute.xlu0 %258 }
 0x163   :  { %v273_v24 = vsel %vm270_vm2, %v248_v20, %v263_v22  ;;  %v271_v25 = vsel %vm270_vm2, %v246_v21, %v259_v23 }
 0x164   :  { %281 = vst.msk [vmem:[%s472_s5 + $0x28] sm:$0xff] %vm276_vm3, %v273_v24  ;;  %277 = vst.msk [vmem:[%s472_s5 + $0x8] sm:$0xff] %vm276_vm3, %v271_v25 }
 0x166   :  { %v265_v28 = vpop.permute.xlu1 %264  ;;  %v261_v29 = vpop.permute.xlu0 %260 }
 0x167   :  { %v274_v30 = vsel %vm270_vm2, %v249_v26, %v265_v28  ;;  %v272_v31 = vsel %vm270_vm2, %v247_v27, %v261_v29 }
 0x168   :  { %283 = vst.msk [vmem:[%s472_s5 + $0x38] sm:$0xff] %vm276_vm3, %v274_v30  ;;  %279 = vst.msk [vmem:[%s472_s5 + $0x18] sm:$0xff] %vm276_vm3, %v272_v31 }
 0x169   :  { %288 = vsyncmov [#allocation3] }
 0x16c   :  { %s289_s8 = vpop.sfrf %288 }
 0x16d   :  { %p334_p6 = scmp.ne.s32.totalorder %s289_s8, 0 }
 0x16f   :  { %293 = shalt.err (%p334_p6)  }

</bundles_post_ra>
